<compile_context>
chip_gen: v6e
topology: v6e:2x2x1
jax: 0.10.0
libtpu: 0.0.40
codegen_flags: <defaults>
</compile_context>

<pallas_src>
import jax
import jax.numpy as jnp
from jax.experimental import pallas as pl
from jax.experimental.pallas import tpu as pltpu

ACT_NUM_BITS = 8
QMAX = float(2 ** (ACT_NUM_BITS - 1) - 1)   # 127
QMIN = -QMAX                                # symmetric signed range [-127, 127]

LANES = 128
SUBLANES = 8
TILE_ROWS = 512                 # 512x128 f32 = 256 KiB per tile (tiled fallback)
_FUSE_MAX_ELEMS = 1 << 20       # <= 4 MiB f32 in + 4 MiB out: safe on v7x VMEM too


def _to_f32(x):
    # avoid emitting a no-op cast when the activation is already f32
    return x if x.dtype == jnp.float32 else x.astype(jnp.float32)


# ------------------------------------------------------------------ fused kernel
def _fused_quant_kernel(x_ref, o_ref):
    """Whole tensor resident in VMEM: calibrate + scale + fake-quant in one pass."""
    x = _to_f32(x_ref[...])
    max_abs = jnp.max(jnp.abs(x))                       # single XLU reduce
    scale = max_abs / QMAX
    inv_s = jnp.where(scale > 0.0, 1.0 / scale, 0.0)    # guard all-zero input
    q = jnp.clip(jnp.round(x * inv_s), QMIN, QMAX)
    o_ref[...] = (q * scale).astype(o_ref.dtype)


# ------------------------------------------------- tiled fallback: abs-max pass
def _absmax_kernel(x_ref, o_ref, acc_ref):
    @pl.when(pl.program_id(0) == 0)
    def _():
        acc_ref[...] = jnp.zeros_like(acc_ref)

    # elementwise running max (VPU only) -- the expensive cross-lane reduction
    # is issued exactly once, in the final step below.
    acc_ref[...] = jnp.maximum(acc_ref[...], jnp.abs(_to_f32(x_ref[...])))

    @pl.when(pl.program_id(0) == pl.num_programs(0) - 1)
    def _():
        o_ref[0, 0] = jnp.max(acc_ref[...])


# ------------------------------------------------ tiled fallback: fake-quant pass
def _fakequant_kernel(scale_ref, x_ref, o_ref):
    s = scale_ref[0]                                    # scalar read from SMEM
    inv_s = jnp.where(s > 0.0, 1.0 / s, 0.0)            # one scalar divide / step
    x = _to_f32(x_ref[...])
    o_ref[...] = (jnp.clip(jnp.round(x * inv_s), QMIN, QMAX) * s).astype(o_ref.dtype)


# ------------------------------------------------------------------- wrapper
def quant_node_forward(x, *, max_fused_elems=_FUSE_MAX_ELEMS):
    """Forward pass of QuantNode: calibrate (abs-max) + symmetric signed fake-quant."""
    orig_shape = x.shape
    orig_dtype = x.dtype
    total = x.size
    flat = x.reshape(-1)

    # TODO(synk): running EMA state update across calls is host-side module state,
    # not part of this single-forward kernel (first-call EMA == batch stats).

    if total <= max_fused_elems:
        # ---- fused single-block path (the spec's 2x4x16x16 activation lands here)
        block_elems = SUBLANES * LANES
        padded = ((total + block_elems - 1) // block_elems) * block_elems
        if padded != total:
            flat = jnp.pad(flat, (0, padded - total))   # zeros: neutral for abs-max
        m = padded // LANES
        x2d = flat.reshape(m, LANES)

        y2d = pl.pallas_call(
            _fused_quant_kernel,
            out_shape=jax.ShapeDtypeStruct((m, LANES), orig_dtype),
        )(x2d)
        return y2d.reshape(-1)[:total].reshape(orig_shape)

    # ---- tiled two-pass path for activations too large for one VMEM block
    block_elems = TILE_ROWS * LANES
    padded = ((total + block_elems - 1) // block_elems) * block_elems
    if padded != total:
        flat = jnp.pad(flat, (0, padded - total))
    m = padded // LANES
    x2d = flat.reshape(m, LANES)
    n_tiles = m // TILE_ROWS

    # Pass 1: global abs-max (calibration statistic).
    max_abs = pl.pallas_call(
        _absmax_kernel,
        out_shape=jax.ShapeDtypeStruct((1, 1), jnp.float32),
        grid=(n_tiles,),
        in_specs=[pl.BlockSpec((TILE_ROWS, LANES), lambda i: (i, 0))],
        out_specs=pl.BlockSpec((1, 1), lambda i: (0, 0)),
        scratch_shapes=[pltpu.VMEM((TILE_ROWS, LANES), jnp.float32)],
        compiler_params=pltpu.CompilerParams(
            dimension_semantics=("arbitrary",)),
    )(x2d)

    # scale = max_abs / qmax (tiny scalar glue), delivered to pass 2 via SMEM.
    scale = (max_abs / QMAX).reshape((1,))

    # Pass 2: fake-quantize with the global scale (parallel / megacore-friendly).
    y2d = pl.pallas_call(
        _fakequant_kernel,
        out_shape=jax.ShapeDtypeStruct((m, LANES), orig_dtype),
        grid=(n_tiles,),
        in_specs=[
            pl.BlockSpec(memory_space=pltpu.MemorySpace.SMEM),        # scale scalar
            pl.BlockSpec((TILE_ROWS, LANES), lambda i: (i, 0)),        # x tile
        ],
        out_specs=pl.BlockSpec((TILE_ROWS, LANES), lambda i: (i, 0)),
        compiler_params=pltpu.CompilerParams(
            dimension_semantics=("parallel",)),
    )(scale, x2d)

    return y2d.reshape(-1)[:total].reshape(orig_shape)


def _reference(x):
    x32 = x.astype(jnp.float32)
    max_abs = jnp.max(jnp.abs(x32))
    scale = max_abs / QMAX
    inv = jnp.where(scale > 0, 1.0 / scale, 0.0)
    return (jnp.clip(jnp.round(x32 * inv), QMIN, QMAX) * scale).astype(x.dtype)


if __name__ == "__main__":
    # NCHW input, consistent with the PyTorch module's expected activations.
    x = jax.random.normal(jax.random.PRNGKey(0), (2, 4, 16, 16), dtype=jnp.float32)

    y = jax.block_until_ready(quant_node_forward(x))          # fused path
    y_ref = _reference(x)
    assert y.shape == x.shape and y.dtype == x.dtype
    assert jnp.allclose(y, y_ref, atol=1e-5, rtol=1e-5)

    # Also exercise the tiled large-activation fallback (force it on a modest shape).
    x_big = jax.random.normal(jax.random.PRNGKey(1), (4, 64, 32, 32), dtype=jnp.float32)
    y_big = jax.block_until_ready(quant_node_forward(x_big, max_fused_elems=0))
    assert jnp.allclose(y_big, _reference(x_big), atol=1e-5, rtol=1e-5)

    print("KERNEL_OK")
</pallas_src>

<mosaic_0001>
module attributes {stable_mosaic.version = 11 : i64} {
  func.func @_fused_quant_kernel(%arg0: memref<16x128xf32, #tpu.memory_space<vmem>>, %arg1: memref<16x128xf32, #tpu.memory_space<vmem>>) attributes {dimension_semantics = [], scalar_prefetch = 0 : i64, scratch_operands = 0 : i64, tpu.core_type = #tpu.core_type<tc>} {
    %c0 = arith.constant 0 : index
    %c0_0 = arith.constant 0 : index
    %0 = vector.load %arg0[%c0, %c0_0] : memref<16x128xf32, #tpu.memory_space<vmem>>, vector<16x128xf32>
    %1 = math.absf %0 : vector<16x128xf32>
    %2 = vector.shape_cast %1 : vector<16x128xf32> to vector<1x16x128xf32>
    %cst = arith.constant dense<0xFF800000> : vector<1xf32>
    %3 = vector.multi_reduction <maximumf>, %2, %cst [1, 2] : vector<1x16x128xf32> to vector<1xf32>
    %4 = vector.shape_cast %3 : vector<1xf32> to vector<1x1x1xf32>
    %5 = vector.extract %4[0, 0, 0] : f32 from vector<1x1x1xf32>
    %cst_1 = arith.constant 1.270000e+02 : f32
    %6 = arith.divf %5, %cst_1 : f32
    %cst_2 = arith.constant 0.000000e+00 : f32
    %7 = arith.cmpf ogt, %6, %cst_2 : f32
    %cst_3 = arith.constant 1.000000e+00 : f32
    %8 = arith.divf %cst_3, %6 : f32
    %cst_4 = arith.constant 0.000000e+00 : f32
    %9 = arith.select %7, %8, %cst_4 : f32
    %10 = vector.broadcast %9 : f32 to vector<16x128xf32>
    %11 = arith.mulf %0, %10 : vector<16x128xf32>
    %12 = math.roundeven %11 : vector<16x128xf32>
    %cst_5 = arith.constant -1.270000e+02 : f32
    %cst_6 = arith.constant 1.270000e+02 : f32
    %13 = vector.broadcast %cst_5 : f32 to vector<16x128xf32>
    %14 = arith.maximumf %13, %12 : vector<16x128xf32>
    %15 = vector.broadcast %cst_6 : f32 to vector<16x128xf32>
    %16 = arith.minimumf %15, %14 : vector<16x128xf32>
    %17 = vector.broadcast %6 : f32 to vector<16x128xf32>
    %18 = arith.mulf %16, %17 : vector<16x128xf32>
    %c0_7 = arith.constant 0 : index
    %c0_8 = arith.constant 0 : index
    %19 = vector.load %arg1[%c0_7, %c0_8] : memref<16x128xf32, #tpu.memory_space<vmem>>, vector<16x128xf32>
    tpu.vector_store %arg1[%c0_7, %c0_8], %18 {strides = array<i32>} : memref<16x128xf32, #tpu.memory_space<vmem>>, vector<16x128xf32>,
    return
  }
}

</mosaic_0001>

<bundles_post_ra>
// kernel: tpu_custom_call.1
= control target key start
LH: loop header
LB: loop body
LE: loop exit
PB: predicated region body
PF: predicated region fallthrough
CT: control target
= control target key end

     0   :  { %6 = vsyncpa [#allocation3], 0  ;;  %s174_s0 = inlined_call_operand.hbm [shape: f32[16,128], index: 0, kind: input, shape index: {}]   ;;  %s175_s1 = inlined_call_operand.hbm [shape: f32[16,128], index: 1, kind: output, shape index: {}]  }
   0x1   :  { %7 = vsyncpa [#allocation4], 0  ;;  %s148_s6 = smov [#allocation2]  }
   0x2   :  { %s13_s7 = sshll.u32 %s148_s6, 4  ;;  %s14_s7 = int_to_ptr.vmem [resolvable:$true] %s13_s7 }
   0x3   :  { %s112_s8 = scalar_lea.vmem %s14_s7, 256  ;;  %p117_p1 = scmp.lt.s32.totalorder %s14_s7, %s14_s7 }
   0x4   :  { %p113_p0 = scmp.ne.s32.totalorder %s14_s7, %s112_s8  ;;  %p118_p2 = scmp.lt.s32.totalorder %s112_s8, %s112_s8 }
   0x6   :  { %p119_p3 = por %p118_p2, %p117_p1 }
   0x8   :  { %p120_p4 = pnand %p119_p3, %p113_p0 }
   0xa   :  { %123 = shalt.err (!%p120_p4)
}
   0xb   :  { %s149_s9 = smov 128   ;;  %s150_s10 = smov 8  }
   0xc   :  { %19 = dma.hbm_to_vmem [thread:$0]  %s174_s0, 256, %s14_s7, [#allocation3], %s149_s9, %s149_s9, %s150_s10  }
   0xd   :  { %144 = dma.done.wait [#allocation3], 256  }
   0xe   :  { %145 = vsyncadd [#allocation3], 4294967040  ;;  %v23_v0 = vld [vmem:[#allocation2] sm:$0xff]  ;;  %v24_v1 = vld [vmem:[#allocation2 + $0x8] sm:$0xff]  ;;  %s151_s15 = smov [#allocation5]  }
   0xf   :  { %v25_v2 = vand.u32 2147483647, %v23_v0  ;;  %v26_v3 = vand.u32 2147483647, %v24_v1  ;;  %s64_s16 = sshll.u32 %s151_s15, 4  ;;  %s65_s16 = int_to_ptr.vmem [resolvable:$true] %s64_s16 }
  0x10   :  { %s124_s17 = scalar_lea.vmem %s65_s16, 256  ;;  %p129_p7 = scmp.lt.s32.totalorder %s65_s16, %s65_s16 }
  0x11   :  { %v27_v4 = vmax.f32.f32 %v25_v2, %v26_v3  ;;  %p125_p6 = scmp.ne.s32.totalorder %s65_s16, %s124_s17  ;;  %p130_p8 = scmp.lt.s32.totalorder %s124_s17, %s124_s17 }
  0x13   :  { %28 = vmax.xlane.f32.xlu0 %v27_v4  ;;  %p131_p9 = por %p130_p8, %p129_p7 }
  0x15   :  { %p132_p10 = pnand %p131_p9, %p125_p6 }
  0x9c   :  { %v29_v5 = vpop.xlane.xlu0 %28 }
  0x9d   :  { %v30_v6 = vrot.slane %v29_v5, 4 }
  0x9f   :  { %v31_v7 = vmax.f32 %v29_v5, %v30_v6 }
  0xa1   :  { %v32_v8 = vrot.slane %v31_v7, 2 }
  0xa3   :  { %v33_v9 = vmax.f32 %v31_v7, %v32_v8 }
  0xa5   :  { %v34_v10 = vrot.slane %v33_v9, 1 }
  0xa7   :  { %v35_v11 = vmax.f32 %v33_v9, %v34_v10 }
  0xa9   :  { %78 = vpush %v35_v11 }
  0xda   :  { %s79_s13 = spop %78 }
  0xdb   :  { %s39_s14 = smul.f32 0.007874016, %s79_s13 }
  0xdd   :  { %v41_v12 = vstv %s39_s14  ;;  %p40_p5 = scmp.gt.f32.partialorder %s39_s14, 0.0 }
  0xde   :  { %102 = vrcp.f32 %v41_v12 }
  0xeb   :  { %v103_v13 = vpop.eup %102 }
  0xec   :  { %80 = vpush %v103_v13 }
 0x11d   :  { %s81_s0 = spop %80 }
 0x11e   :  { %s177_s0 = smov (!%p40_p5, %s81_s0), 0.0 }
 0x11f   :  { %v45_v14 = vstv %s177_s0 }
 0x120   :  { %v46_v15 = vmul.f32 %v45_v14, %v23_v0  ;;  %v47_v16 = vmul.f32 %v45_v14, %v24_v1 }
 0x122   :  { %v84_v17 = vcvt.f32.s32 %v46_v15  ;;  %v92_v18 = vcvt.f32.s32 %v47_v16  ;;  %v82_v20 = vand.u32 2147483647, %v46_v15  ;;  %v87_v23 = vand.u32 2147483648, %v46_v15 }
 0x123   :  { %v90_v24 = vand.u32 2147483647, %v47_v16  ;;  %v95_v26 = vand.u32 2147483648, %v47_v16 }
 0x124   :  { %v85_v19 = vcvt.s32.f32 %v84_v17  ;;  %v93_v21 = vcvt.s32.f32 %v92_v18  ;;  %vm83_vm0 = vcmp.lt.f32.partialorder %v82_v20, 8388608.0 }
 0x125   :  { %vm91_vm1 = vcmp.lt.f32.partialorder %v90_v24, 8388608.0 }
 0x126   :  { %v86_v22 = vand.u32 2147483647, %v85_v19  ;;  %v94_v25 = vand.u32 2147483647, %v93_v21 }
 0x128   :  { %v88_v27 = vor.u32 %v87_v23, %v86_v22  ;;  %v96_v28 = vor.u32 %v95_v26, %v94_v25 }
 0x12a   :  { %v89_v29 = vsel %vm83_vm0, %v88_v27, %v46_v15  ;;  %v97_v30 = vsel %vm91_vm1, %v96_v28, %v47_v16 }
 0x12b   :  { %v76_v31 = vclamps-f32 %v89_v29, 127.0  ;;  %v77_v32 = vclamps-f32 %v97_v30, 127.0 }
 0x12d   :  { %v55_v33 = vmul.f32 %v76_v31, %v41_v12  ;;  %v56_v34 = vmul.f32 %v77_v32, %v41_v12 }
 0x12f   :  { %57 = vst [vmem:[#allocation5] sm:$0xff] %v55_v33  ;;  %58 = vst [vmem:[#allocation5 + $0x8] sm:$0xff] %v56_v34 }
 0x130   :  { %135 = shalt.err (!%p132_p10)
}
 0x131   :  { %70 = dma.vmem_to_hbm [thread:$0]  %s65_s16, 256, %s175_s1, [#allocation4], %s149_s9, %s149_s9, %s150_s10  }
 0x132   :  { %146 = dma.done.wait [#allocation4], 256  }
 0x133   :  { %147 = vsyncadd [#allocation4], 4294967040 }
 0x134   :  { %74 = vsyncpa [#allocation3], 1 }
 0x135   :  { %75 = vsyncpa [#allocation4], 1 }

</bundles_post_ra>
